<compile_context>
chip_gen: v6e
topology: v6e:2x2x1
jax: 0.10.0
libtpu: 0.0.40
codegen_flags: <defaults>
</compile_context>

<pallas_src>
import functools

import jax
import jax.numpy as jnp
from jax import lax
from jax.experimental import pallas as pl
from jax.experimental.pallas import tpu as pltpu


def _round_up(x, m):
    return ((x + m - 1) // m) * m


def _lstm_kernel(tok_ref,     # (Ts, Bt, 1)  int32 token ids (streamed per sequence tile)
                 proj_ref,    # (Vp, Gp)     f32  fused embedding@W_ih + bias table (resident)
                 w_hh_ref,    # (H, Gp)      bf16 recurrent weight, gates packed densely
                 w_fc_ref,    # (H, 128)     f32  fc weight, output padded to 128 lanes
                 b_fc_ref,    # (1, 128)     f32  fc bias, padded
                 out_ref,     # (Bt, 128)    f32  sigmoid(fc(h_last)), padded
                 h_sc,        # (Bt, H)      f32  VMEM scratch: h state across seq blocks
                 c_sc,        # (Bt, H)      f32  VMEM scratch: c state across seq blocks
                 xg_sc):      # (Ts, Bt, Gp) f32  VMEM scratch: per-token gate pre-activations
    s = pl.program_id(1)                      # sequence-block index (inner, serial axis)
    num_s = pl.num_programs(1)
    Ts, Bt, _ = tok_ref.shape
    Vp, Gp = proj_ref.shape
    H = h_sc.shape[1]

    @pl.when(s == 0)
    def _init():
        h_sc[...] = jnp.zeros_like(h_sc)
        c_sc[...] = jnp.zeros_like(c_sc)

    # ---- fused embedding lookup + input projection, hoisted OFF the recurrent chain ----------
    # one_hot(tokens) @ proj_table  ==  embedding[tokens] @ W_ih + (b_ih + b_hh)
    tok = tok_ref[...]                                                       # (Ts, Bt, 1)
    onehot = (tok == lax.broadcasted_iota(jnp.int32, (Ts, Bt, Vp), 2))
    onehot = onehot.astype(jnp.float32)                                      # (Ts, Bt, Vp)
    xg = jnp.dot(onehot.reshape(Ts * Bt, Vp), proj_ref[...],
                 preferred_element_type=jnp.float32)                         # (Ts*Bt, Gp)
    xg_sc[...] = xg.reshape(Ts, Bt, Gp)

    # Small (H, Gp) bf16 weight: hoisted once per grid step (a few vregs after the shrink).
    w_hh = w_hh_ref[...]

    def step(t, carry):
        h_prev, c_prev = carry                                               # (Bt, H) f32
        # Single bf16 MXU matmul per step on the serial chain; f32 accumulate.
        gates = xg_sc[t] + jnp.dot(h_prev.astype(jnp.bfloat16), w_hh,
                                   preferred_element_type=jnp.float32)       # (Bt, Gp)
        sg = jax.nn.sigmoid(gates)                 # one EUP pass over the packed gate vreg
        i_g = sg[:, 0 * H:1 * H]
        f_g = sg[:, 1 * H:2 * H]
        o_g = sg[:, 3 * H:4 * H]
        g_g = jnp.tanh(gates[:, 2 * H:3 * H])      # one EUP pass on the g slice
        c_new = f_g * c_prev + i_g * g_g
        h_new = o_g * jnp.tanh(c_new)
        return h_new, c_new

    # Carry h/c as loop-carried values (vregs); touch VMEM scratch only at block boundaries.
    unroll = True if Ts <= 16 else (8 if Ts >= 64 else 4)
    h_last, c_last = lax.fori_loop(0, Ts, step, (h_sc[...], c_sc[...]), unroll=unroll)
    h_sc[...] = h_last
    c_sc[...] = c_last

    @pl.when(s == num_s - 1)
    def _finalize():
        logits = jnp.dot(h_last, w_fc_ref[...],
                         preferred_element_type=jnp.float32) + b_fc_ref[...]
        out_ref[...] = jax.nn.sigmoid(logits)


@functools.partial(jax.jit, static_argnames=("hidden_dim", "seq_tile", "batch_tile"))
def lstm_model_forward(x_tokens, params, *, hidden_dim, seq_tile=None, batch_tile=None):
    """Forward pass matching LSTMModel.forward.

    x_tokens : (seq_len, batch) int32 token ids (seq-first, like nn.LSTM default)
    returns  : (batch, 1) float32 in (0, 1)
    """
    emb_table = params["embedding"].astype(jnp.float32)   # (V, E)
    w_ih = params["w_ih"]                                  # (E, 4H)  (transposed, gates i,f,g,o)
    w_hh = params["w_hh"]                                  # (H, 4H)
    b = params["b"]                                        # (1, 4H)  (b_ih + b_hh)
    w_fc = params["w_fc"]                                  # (H, 1)
    b_fc = params["b_fc"]                                  # (1, 1)

    S, B = x_tokens.shape
    V = emb_table.shape[0]
    H = hidden_dim
    G = 4 * H
    Gp = _round_up(G, 128)      # densely packed gates, padded once to a lane multiple
    Vp = _round_up(V, 128)      # vocab rows padded so the one-hot matmul K-dim is lane-dense
    Bp = _round_up(B, 8)        # sublane-aligned batch (f32)

    # TODO(synk): the VMEM-resident (Vp, Gp) projection table only scales to small vocabularies
    # (V=50 here); for large V, fall back to a glue-side gather of the projected rows.

    # Fused embedding + input projection table (bias folded in), gates packed densely.
    proj = jnp.dot(emb_table, w_ih) + b                                   # (V, 4H)
    proj = jnp.pad(proj, ((0, Vp - V), (0, Gp - G)))                      # (Vp, Gp) f32

    w_hh_p = jnp.pad(w_hh, ((0, 0), (0, Gp - G))).astype(jnp.bfloat16)    # (H, Gp) bf16
    w_fc_p = jnp.pad(w_fc, ((0, 0), (0, 128 - w_fc.shape[1])))            # (H, 128)
    b_fc_p = jnp.pad(b_fc, ((0, 0), (0, 128 - b_fc.shape[1])))            # (1, 128)

    tok = jnp.pad(x_tokens.astype(jnp.int32), ((0, 0), (0, Bp - B)))      # (S, Bp)
    tok = tok[..., None]                                                  # (S, Bp, 1)

    # ---- tiling -----------------------------------------------------------------------------
    if batch_tile is None:
        # Fill the MXU LHS rows before splitting batch across grid blocks / TensorCores.
        batch_tile = Bp if Bp <= 256 else 256
    Bt = max(8, min(_round_up(batch_tile, 8), Bp))
    while Bp % Bt:
        Bt -= 8

    if seq_tile is None:
        # Derive the sequence tile from a VMEM budget for the per-tile gate scratch
        # (seq_tile * Bt * Gp * 4 bytes); keep tiles >= 32 to amortize per-grid-step overhead.
        budget_bytes = 4 * 1024 * 1024
        per_step = Bt * Gp * 4
        target = max(32, min(budget_bytes // per_step, 512))
        seq_tile = min(S, target)
        while S % seq_tile:
            seq_tile -= 1
    assert S % seq_tile == 0 and Bp % Bt == 0

    grid = (Bp // Bt, S // seq_tile)   # (parallel batch blocks, serial sequence blocks)

    out = pl.pallas_call(
        _lstm_kernel,
        out_shape=jax.ShapeDtypeStruct((Bp, 128), jnp.float32),
        grid_spec=pltpu.PrefetchScalarGridSpec(
            num_scalar_prefetch=0,
            grid=grid,
            in_specs=[
                pl.BlockSpec((seq_tile, Bt, 1), lambda bb, sb: (sb, bb, 0)),  # streamed tokens
                pl.BlockSpec((Vp, Gp), lambda bb, sb: (0, 0)),                # resident proj table
                pl.BlockSpec((H, Gp), lambda bb, sb: (0, 0)),                 # resident w_hh (bf16)
                pl.BlockSpec((H, 128), lambda bb, sb: (0, 0)),
                pl.BlockSpec((1, 128), lambda bb, sb: (0, 0)),
            ],
            out_specs=pl.BlockSpec((Bt, 128), lambda bb, sb: (bb, 0)),        # resident output
            scratch_shapes=[
                pltpu.VMEM((Bt, H), jnp.float32),                 # h state across seq blocks
                pltpu.VMEM((Bt, H), jnp.float32),                 # c state across seq blocks
                pltpu.VMEM((seq_tile, Bt, Gp), jnp.float32),      # per-tile gate pre-activations
            ],
        ),
        compiler_params=pltpu.CompilerParams(
            # Batch blocks are independent (v7x 2-TC sharding); the recurrence is serial over seq.
            dimension_semantics=("parallel", "arbitrary"),
            vmem_limit_bytes=32 * 1024 * 1024,                    # safe on v5e/v6e/v7x
        ),
    )(tok, proj, w_hh_p, w_fc_p, b_fc_p)

    return out[:B, :1]


def lstm_model_reference(x_tokens, params, hidden_dim):
    """Pure-JAX reference mirroring PyTorch LSTMModel.forward."""
    emb = params["embedding"].astype(jnp.float32)
    embedded = jnp.take(emb, x_tokens, axis=0)        # (S, B, E)
    S, B, _ = embedded.shape
    H = hidden_dim
    w_ih, w_hh, b = params["w_ih"], params["w_hh"], params["b"]
    h = jnp.zeros((B, H), jnp.float32)
    c = jnp.zeros((B, H), jnp.float32)
    for t in range(S):
        gates = embedded[t] @ w_ih + h @ w_hh + b
        i = jax.nn.sigmoid(gates[:, 0 * H:1 * H])
        f = jax.nn.sigmoid(gates[:, 1 * H:2 * H])
        g = jnp.tanh(gates[:, 2 * H:3 * H])
        o = jax.nn.sigmoid(gates[:, 3 * H:4 * H])
        c = f * c + i * g
        h = o * jnp.tanh(c)
    return jax.nn.sigmoid(h @ params["w_fc"] + params["b_fc"])


def init_params(key, vocab_size, embedding_dim, hidden_dim):
    """Deterministic parameter init mirroring the PyTorch module's shapes.

    PyTorch layouts:
      embedding.weight : (V, E)
      lstm.weight_ih_l0: (4H, E)   -> stored transposed (E, 4H)
      lstm.weight_hh_l0: (4H, H)   -> stored transposed (H, 4H)
      lstm.bias_ih_l0 + lstm.bias_hh_l0 : combined (1, 4H)
      fc.weight : (1, H)           -> stored transposed (H, 1)
      fc.bias   : (1,)             -> (1, 1)
    Gate order along the 4H axis is (i, f, g, o), same as PyTorch.
    """
    k_emb, k_wih, k_whh, k_bih, k_bhh, k_wfc, k_bfc = jax.random.split(key, 7)
    E, H, V = embedding_dim, hidden_dim, vocab_size
    s = 1.0 / jnp.sqrt(jnp.float32(H))
    return {
        "embedding": jax.random.normal(k_emb, (V, E), jnp.float32),
        "w_ih": jax.random.uniform(k_wih, (E, 4 * H), jnp.float32, -s, s),
        "w_hh": jax.random.uniform(k_whh, (H, 4 * H), jnp.float32, -s, s),
        "b": (jax.random.uniform(k_bih, (1, 4 * H), jnp.float32, -s, s)
              + jax.random.uniform(k_bhh, (1, 4 * H), jnp.float32, -s, s)),
        "w_fc": jax.random.uniform(k_wfc, (H, 1), jnp.float32, -s, s),
        "b_fc": jax.random.uniform(k_bfc, (1, 1), jnp.float32, -s, s),
    }


if __name__ == "__main__":
    vocab_size = 50
    embedding_dim = 16
    hidden_dim = 32
    seq_len = 8
    batch = 2

    key = jax.random.PRNGKey(0)
    k_params, k_tokens = jax.random.split(key)

    params = init_params(k_params, vocab_size, embedding_dim, hidden_dim)
    x_tokens = jax.random.randint(k_tokens, (seq_len, batch), 0, vocab_size,
                                  dtype=jnp.int32)

    ref = jax.block_until_ready(lstm_model_reference(x_tokens, params, hidden_dim))

    # seq_tile=4 -> two sequence blocks: exercises the resident-state / multi-block carry path.
    out = lstm_model_forward(x_tokens, params, hidden_dim=hidden_dim, seq_tile=4)
    out = jax.block_until_ready(out)

    assert out.shape == (batch, 1)
    assert bool(jnp.all((out > 0.0) & (out < 1.0)))
    # Tolerance loosened slightly vs. pure-f32: the recurrent matmul runs with bf16 MXU
    # operands (f32 accumulate).
    assert bool(jnp.allclose(out, ref, atol=5e-3, rtol=5e-3)), (out, ref)

    # Default (budget-derived) tiling path: single sequence block at this size.
    out2 = jax.block_until_ready(
        lstm_model_forward(x_tokens, params, hidden_dim=hidden_dim))
    assert bool(jnp.allclose(out2, ref, atol=5e-3, rtol=5e-3)), (out2, ref)

    print("KERNEL_OK")
</pallas_src>

<mosaic_0001>
module attributes {stable_mosaic.version = 11 : i64} {
  func.func @_lstm_kernel(%arg0: i32, %arg1: i32, %arg2: memref<4x8x1xi32, #tpu.memory_space<vmem>>, %arg3: memref<128x128xf32, #tpu.memory_space<vmem>>, %arg4: memref<32x128xbf16, #tpu.memory_space<vmem>>, %arg5: memref<32x128xf32, #tpu.memory_space<vmem>>, %arg6: memref<1x128xf32, #tpu.memory_space<vmem>>, %arg7: memref<8x128xf32, #tpu.memory_space<vmem>>, %arg8: memref<8x32xf32, #tpu.memory_space<vmem>>, %arg9: memref<8x32xf32, #tpu.memory_space<vmem>>, %arg10: memref<4x8x128xf32, #tpu.memory_space<vmem>>) attributes {dimension_semantics = [#tpu.dimension_semantics<parallel>, #tpu.dimension_semantics<arbitrary>], iteration_bounds = array<i64: 1, 2>, scalar_prefetch = 0 : i64, scratch_operands = 3 : i64, tpu.core_type = #tpu.core_type<tc>, window_params = [{transform_indices = @transform_0, window_bounds = array<i64: 4, 8, 1>}, {pipeline_mode = #tpu.pipeline_mode<synchronous>, transform_indices = @transform_1, window_bounds = array<i64: 128, 128>}, {pipeline_mode = #tpu.pipeline_mode<synchronous>, transform_indices = @transform_2, window_bounds = array<i64: 32, 128>}, {pipeline_mode = #tpu.pipeline_mode<synchronous>, transform_indices = @transform_3, window_bounds = array<i64: 32, 128>}, {pipeline_mode = #tpu.pipeline_mode<synchronous>, transform_indices = @transform_4, window_bounds = array<i64: 1, 128>}, {transform_indices = @transform_5, window_bounds = array<i64: 8, 128>}]} {
    %c0_i32 = arith.constant 0 : i32
    %0 = arith.cmpi eq, %arg1, %c0_i32 : i32
    %1 = arith.extui %0 : i1 to i32
    %c0_i32_0 = arith.constant 0 : i32
    %2 = arith.cmpi ne, %1, %c0_i32_0 : i32
    scf.if %2 {
      %cst_37 = arith.constant 0.000000e+00 : f32
      %106 = vector.broadcast %cst_37 : f32 to vector<8x32xf32>
      %c0_38 = arith.constant 0 : index
      %c0_39 = arith.constant 0 : index
      %107 = vector.load %arg8[%c0_38, %c0_39] : memref<8x32xf32, #tpu.memory_space<vmem>>, vector<8x32xf32>
      tpu.vector_store %arg8[%c0_38, %c0_39], %106 {strides = array<i32>} : memref<8x32xf32, #tpu.memory_space<vmem>>, vector<8x32xf32>,
      %cst_40 = arith.constant 0.000000e+00 : f32
      %108 = vector.broadcast %cst_40 : f32 to vector<8x32xf32>
      %c0_41 = arith.constant 0 : index
      %c0_42 = arith.constant 0 : index
      %109 = vector.load %arg9[%c0_41, %c0_42] : memref<8x32xf32, #tpu.memory_space<vmem>>, vector<8x32xf32>
      tpu.vector_store %arg9[%c0_41, %c0_42], %108 {strides = array<i32>} : memref<8x32xf32, #tpu.memory_space<vmem>>, vector<8x32xf32>,
    } else {
    }
    %c0 = arith.constant 0 : index
    %c0_1 = arith.constant 0 : index
    %c0_2 = arith.constant 0 : index
    %3 = vector.load %arg2[%c0, %c0_1, %c0_2] : memref<4x8x1xi32, #tpu.memory_space<vmem>>, vector<4x8x1xi32>
    %4 = tpu.iota {dimensions = array<i32: 2>} : vector<4x8x128xi32>
    %5 = vector.broadcast %3 : vector<4x8x1xi32> to vector<4x8x128xi32>
    %6 = arith.cmpi eq, %5, %4 : vector<4x8x128xi32>
    %7 = arith.extui %6 : vector<4x8x128xi1> to vector<4x8x128xi32>
    %8 = arith.sitofp %7 : vector<4x8x128xi32> to vector<4x8x128xf32>
    %9 = vector.shape_cast %8 : vector<4x8x128xf32> to vector<32x128xf32>
    %c0_3 = arith.constant 0 : index
    %c0_4 = arith.constant 0 : index
    %10 = vector.load %arg3[%c0_3, %c0_4] : memref<128x128xf32, #tpu.memory_space<vmem>>, vector<128x128xf32>
    %cst = arith.constant dense<0.000000e+00> : vector<32x128xf32>
    %11 = tpu.matmul %9, %10, %cst {dimension_numbers = #tpu.dot_dimension_numbers<[1], [0], [0], [1], [0, 0, 1, 1], [], []>} : vector<32x128xf32>, vector<128x128xf32>, vector<32x128xf32> -> vector<32x128xf32>
    %12 = vector.shape_cast %11 : vector<32x128xf32> to vector<4x8x128xf32>
    %c0_5 = arith.constant 0 : index
    %c0_6 = arith.constant 0 : index
    %c0_7 = arith.constant 0 : index
    %13 = vector.load %arg10[%c0_5, %c0_6, %c0_7] : memref<4x8x128xf32, #tpu.memory_space<vmem>>, vector<4x8x128xf32>
    tpu.vector_store %arg10[%c0_5, %c0_6, %c0_7], %12 {strides = array<i32>} : memref<4x8x128xf32, #tpu.memory_space<vmem>>, vector<4x8x128xf32>,
    %c0_8 = arith.constant 0 : index
    %c0_9 = arith.constant 0 : index
    %14 = vector.load %arg4[%c0_8, %c0_9] : memref<32x128xbf16, #tpu.memory_space<vmem>>, vector<32x128xbf16>
    %c0_10 = arith.constant 0 : index
    %c0_11 = arith.constant 0 : index
    %15 = vector.load %arg8[%c0_10, %c0_11] : memref<8x32xf32, #tpu.memory_space<vmem>>, vector<8x32xf32>
    %c0_12 = arith.constant 0 : index
    %c0_13 = arith.constant 0 : index
    %16 = vector.load %arg9[%c0_12, %c0_13] : memref<8x32xf32, #tpu.memory_space<vmem>>, vector<8x32xf32>
    %c0_i32_14 = arith.constant 0 : i32
    %17 = arith.index_cast %c0_i32_14 : i32 to index
    %c0_15 = arith.constant 0 : index
    %c0_16 = arith.constant 0 : index
    %18 = vector.load %arg10[%17, %c0_15, %c0_16] : memref<4x8x128xf32, #tpu.memory_space<vmem>>, vector<1x8x128xf32>
    %19 = vector.shape_cast %18 : vector<1x8x128xf32> to vector<8x128xf32>
    %20 = arith.truncf %15 : vector<8x32xf32> to vector<8x32xbf16>
    %cst_17 = arith.constant dense<0.000000e+00> : vector<8x128xf32>
    %21 = tpu.matmul %20, %14, %cst_17 {dimension_numbers = #tpu.dot_dimension_numbers<[1], [0], [0], [1], [0, 0, 1, 1], [], []>} : vector<8x32xbf16>, vector<32x128xbf16>, vector<8x128xf32> -> vector<8x128xf32>
    %22 = arith.addf %19, %21 : vector<8x128xf32>
    %23 = arith.negf %22 : vector<8x128xf32>
    %24 = math.exp %23 : vector<8x128xf32>
    %cst_18 = arith.constant 1.000000e+00 : f32
    %25 = vector.broadcast %cst_18 : f32 to vector<8x128xf32>
    %26 = arith.addf %25, %24 : vector<8x128xf32>
    %27 = arith.divf %25, %26 : vector<8x128xf32>
    %28 = vector.extract_strided_slice %27 {offsets = [0, 0], sizes = [8, 32], strides = [1, 1]} : vector<8x128xf32> to vector<8x32xf32>
    %29 = vector.extract_strided_slice %27 {offsets = [0, 32], sizes = [8, 32], strides = [1, 1]} : vector<8x128xf32> to vector<8x32xf32>
    %30 = vector.extract_strided_slice %27 {offsets = [0, 96], sizes = [8, 32], strides = [1, 1]} : vector<8x128xf32> to vector<8x32xf32>
    %31 = vector.extract_strided_slice %22 {offsets = [0, 64], sizes = [8, 32], strides = [1, 1]} : vector<8x128xf32> to vector<8x32xf32>
    %32 = math.tanh %31 : vector<8x32xf32>
    %33 = arith.mulf %29, %16 : vector<8x32xf32>
    %34 = arith.mulf %28, %32 : vector<8x32xf32>
    %35 = arith.addf %33, %34 : vector<8x32xf32>
    %36 = math.tanh %35 : vector<8x32xf32>
    %37 = arith.mulf %30, %36 : vector<8x32xf32>
    %c1_i32 = arith.constant 1 : i32
    %38 = arith.index_cast %c1_i32 : i32 to index
    %c0_19 = arith.constant 0 : index
    %c0_20 = arith.constant 0 : index
    %39 = vector.load %arg10[%38, %c0_19, %c0_20] : memref<4x8x128xf32, #tpu.memory_space<vmem>>, vector<1x8x128xf32>
    %40 = vector.shape_cast %39 : vector<1x8x128xf32> to vector<8x128xf32>
    %41 = arith.truncf %37 : vector<8x32xf32> to vector<8x32xbf16>
    %cst_21 = arith.constant dense<0.000000e+00> : vector<8x128xf32>
    %42 = tpu.matmul %41, %14, %cst_21 {dimension_numbers = #tpu.dot_dimension_numbers<[1], [0], [0], [1], [0, 0, 1, 1], [], []>} : vector<8x32xbf16>, vector<32x128xbf16>, vector<8x128xf32> -> vector<8x128xf32>
    %43 = arith.addf %40, %42 : vector<8x128xf32>
    %44 = arith.negf %43 : vector<8x128xf32>
    %45 = math.exp %44 : vector<8x128xf32>
    %cst_22 = arith.constant 1.000000e+00 : f32
    %46 = vector.broadcast %cst_22 : f32 to vector<8x128xf32>
    %47 = arith.addf %46, %45 : vector<8x128xf32>
    %48 = arith.divf %46, %47 : vector<8x128xf32>
    %49 = vector.extract_strided_slice %48 {offsets = [0, 0], sizes = [8, 32], strides = [1, 1]} : vector<8x128xf32> to vector<8x32xf32>
    %50 = vector.extract_strided_slice %48 {offsets = [0, 32], sizes = [8, 32], strides = [1, 1]} : vector<8x128xf32> to vector<8x32xf32>
    %51 = vector.extract_strided_slice %48 {offsets = [0, 96], sizes = [8, 32], strides = [1, 1]} : vector<8x128xf32> to vector<8x32xf32>
    %52 = vector.extract_strided_slice %43 {offsets = [0, 64], sizes = [8, 32], strides = [1, 1]} : vector<8x128xf32> to vector<8x32xf32>
    %53 = math.tanh %52 : vector<8x32xf32>
    %54 = arith.mulf %50, %35 : vector<8x32xf32>
    %55 = arith.mulf %49, %53 : vector<8x32xf32>
    %56 = arith.addf %54, %55 : vector<8x32xf32>
    %57 = math.tanh %56 : vector<8x32xf32>
    %58 = arith.mulf %51, %57 : vector<8x32xf32>
    %c2_i32 = arith.constant 2 : i32
    %59 = arith.index_cast %c2_i32 : i32 to index
    %c0_23 = arith.constant 0 : index
    %c0_24 = arith.constant 0 : index
    %60 = vector.load %arg10[%59, %c0_23, %c0_24] : memref<4x8x128xf32, #tpu.memory_space<vmem>>, vector<1x8x128xf32>
    %61 = vector.shape_cast %60 : vector<1x8x128xf32> to vector<8x128xf32>
    %62 = arith.truncf %58 : vector<8x32xf32> to vector<8x32xbf16>
    %cst_25 = arith.constant dense<0.000000e+00> : vector<8x128xf32>
    %63 = tpu.matmul %62, %14, %cst_25 {dimension_numbers = #tpu.dot_dimension_numbers<[1], [0], [0], [1], [0, 0, 1, 1], [], []>} : vector<8x32xbf16>, vector<32x128xbf16>, vector<8x128xf32> -> vector<8x128xf32>
    %64 = arith.addf %61, %63 : vector<8x128xf32>
    %65 = arith.negf %64 : vector<8x128xf32>
    %66 = math.exp %65 : vector<8x128xf32>
    %cst_26 = arith.constant 1.000000e+00 : f32
    %67 = vector.broadcast %cst_26 : f32 to vector<8x128xf32>
    %68 = arith.addf %67, %66 : vector<8x128xf32>
    %69 = arith.divf %67, %68 : vector<8x128xf32>
    %70 = vector.extract_strided_slice %69 {offsets = [0, 0], sizes = [8, 32], strides = [1, 1]} : vector<8x128xf32> to vector<8x32xf32>
    %71 = vector.extract_strided_slice %69 {offsets = [0, 32], sizes = [8, 32], strides = [1, 1]} : vector<8x128xf32> to vector<8x32xf32>
    %72 = vector.extract_strided_slice %69 {offsets = [0, 96], sizes = [8, 32], strides = [1, 1]} : vector<8x128xf32> to vector<8x32xf32>
    %73 = vector.extract_strided_slice %64 {offsets = [0, 64], sizes = [8, 32], strides = [1, 1]} : vector<8x128xf32> to vector<8x32xf32>
    %74 = math.tanh %73 : vector<8x32xf32>
    %75 = arith.mulf %71, %56 : vector<8x32xf32>
    %76 = arith.mulf %70, %74 : vector<8x32xf32>
    %77 = arith.addf %75, %76 : vector<8x32xf32>
    %78 = math.tanh %77 : vector<8x32xf32>
    %79 = arith.mulf %72, %78 : vector<8x32xf32>
    %c3_i32 = arith.constant 3 : i32
    %80 = arith.index_cast %c3_i32 : i32 to index
    %c0_27 = arith.constant 0 : index
    %c0_28 = arith.constant 0 : index
    %81 = vector.load %arg10[%80, %c0_27, %c0_28] : memref<4x8x128xf32, #tpu.memory_space<vmem>>, vector<1x8x128xf32>
    %82 = vector.shape_cast %81 : vector<1x8x128xf32> to vector<8x128xf32>
    %83 = arith.truncf %79 : vector<8x32xf32> to vector<8x32xbf16>
    %cst_29 = arith.constant dense<0.000000e+00> : vector<8x128xf32>
    %84 = tpu.matmul %83, %14, %cst_29 {dimension_numbers = #tpu.dot_dimension_numbers<[1], [0], [0], [1], [0, 0, 1, 1], [], []>} : vector<8x32xbf16>, vector<32x128xbf16>, vector<8x128xf32> -> vector<8x128xf32>
    %85 = arith.addf %82, %84 : vector<8x128xf32>
    %86 = arith.negf %85 : vector<8x128xf32>
    %87 = math.exp %86 : vector<8x128xf32>
    %cst_30 = arith.constant 1.000000e+00 : f32
    %88 = vector.broadcast %cst_30 : f32 to vector<8x128xf32>
    %89 = arith.addf %88, %87 : vector<8x128xf32>
    %90 = arith.divf %88, %89 : vector<8x128xf32>
    %91 = vector.extract_strided_slice %90 {offsets = [0, 0], sizes = [8, 32], strides = [1, 1]} : vector<8x128xf32> to vector<8x32xf32>
    %92 = vector.extract_strided_slice %90 {offsets = [0, 32], sizes = [8, 32], strides = [1, 1]} : vector<8x128xf32> to vector<8x32xf32>
    %93 = vector.extract_strided_slice %90 {offsets = [0, 96], sizes = [8, 32], strides = [1, 1]} : vector<8x128xf32> to vector<8x32xf32>
    %94 = vector.extract_strided_slice %85 {offsets = [0, 64], sizes = [8, 32], strides = [1, 1]} : vector<8x128xf32> to vector<8x32xf32>
    %95 = math.tanh %94 : vector<8x32xf32>
    %96 = arith.mulf %92, %77 : vector<8x32xf32>
    %97 = arith.mulf %91, %95 : vector<8x32xf32>
    %98 = arith.addf %96, %97 : vector<8x32xf32>
    %99 = math.tanh %98 : vector<8x32xf32>
    %100 = arith.mulf %93, %99 : vector<8x32xf32>
    %c4_i32 = arith.constant 4 : i32
    %c0_31 = arith.constant 0 : index
    %c0_32 = arith.constant 0 : index
    %101 = vector.load %arg8[%c0_31, %c0_32] : memref<8x32xf32, #tpu.memory_space<vmem>>, vector<8x32xf32>
    tpu.vector_store %arg8[%c0_31, %c0_32], %100 {strides = array<i32>} : memref<8x32xf32, #tpu.memory_space<vmem>>, vector<8x32xf32>,
    %c0_33 = arith.constant 0 : index
    %c0_34 = arith.constant 0 : index
    %102 = vector.load %arg9[%c0_33, %c0_34] : memref<8x32xf32, #tpu.memory_space<vmem>>, vector<8x32xf32>
    tpu.vector_store %arg9[%c0_33, %c0_34], %98 {strides = array<i32>} : memref<8x32xf32, #tpu.memory_space<vmem>>, vector<8x32xf32>,
    %c1_i32_35 = arith.constant 1 : i32
    %103 = arith.cmpi eq, %arg1, %c1_i32_35 : i32
    %104 = arith.extui %103 : i1 to i32
    %c0_i32_36 = arith.constant 0 : i32
    %105 = arith.cmpi ne, %104, %c0_i32_36 : i32
    scf.if %105 {
      %c0_37 = arith.constant 0 : index
      %c0_38 = arith.constant 0 : index
      %106 = vector.load %arg5[%c0_37, %c0_38] : memref<32x128xf32, #tpu.memory_space<vmem>>, vector<32x128xf32>
      %cst_39 = arith.constant dense<0.000000e+00> : vector<8x128xf32>
      %107 = tpu.matmul %100, %106, %cst_39 {dimension_numbers = #tpu.dot_dimension_numbers<[1], [0], [0], [1], [0, 0, 1, 1], [], []>} : vector<8x32xf32>, vector<32x128xf32>, vector<8x128xf32> -> vector<8x128xf32>
      %c0_40 = arith.constant 0 : index
      %c0_41 = arith.constant 0 : index
      %108 = vector.load %arg6[%c0_40, %c0_41] : memref<1x128xf32, #tpu.memory_space<vmem>>, vector<1x128xf32>
      %109 = vector.broadcast %108 : vector<1x128xf32> to vector<8x128xf32>
      %110 = arith.addf %107, %109 : vector<8x128xf32>
      %111 = arith.negf %110 : vector<8x128xf32>
      %112 = math.exp %111 : vector<8x128xf32>
      %cst_42 = arith.constant 1.000000e+00 : f32
      %113 = vector.broadcast %cst_42 : f32 to vector<8x128xf32>
      %114 = arith.addf %113, %112 : vector<8x128xf32>
      %115 = arith.divf %113, %114 : vector<8x128xf32>
      %c0_43 = arith.constant 0 : index
      %c0_44 = arith.constant 0 : index
      %116 = vector.load %arg7[%c0_43, %c0_44] : memref<8x128xf32, #tpu.memory_space<vmem>>, vector<8x128xf32>
      tpu.vector_store %arg7[%c0_43, %c0_44], %115 {strides = array<i32>} : memref<8x128xf32, #tpu.memory_space<vmem>>, vector<8x128xf32>,
    } else {
    }
    return
  }
  func.func @transform_0(%arg0: i32, %arg1: i32) -> (i32, i32, i32) {
    %c0_i32 = arith.constant 0 : i32
    %c0_i32_0 = arith.constant 0 : i32
    return %arg1, %arg0, %c0_i32 : i32, i32, i32
  }
  func.func @transform_1(%arg0: i32, %arg1: i32) -> (i32, i32) {
    %c0_i32 = arith.constant 0 : i32
    %c0_i32_0 = arith.constant 0 : i32
    %c0_i32_1 = arith.constant 0 : i32
    return %c0_i32, %c0_i32_0 : i32, i32
  }
  func.func @transform_2(%arg0: i32, %arg1: i32) -> (i32, i32) {
    %c0_i32 = arith.constant 0 : i32
    %c0_i32_0 = arith.constant 0 : i32
    %c0_i32_1 = arith.constant 0 : i32
    return %c0_i32, %c0_i32_0 : i32, i32
  }
  func.func @transform_3(%arg0: i32, %arg1: i32) -> (i32, i32) {
    %c0_i32 = arith.constant 0 : i32
    %c0_i32_0 = arith.constant 0 : i32
    %c0_i32_1 = arith.constant 0 : i32
    return %c0_i32, %c0_i32_0 : i32, i32
  }
  func.func @transform_4(%arg0: i32, %arg1: i32) -> (i32, i32) {
    %c0_i32 = arith.constant 0 : i32
    %c0_i32_0 = arith.constant 0 : i32
    %c0_i32_1 = arith.constant 0 : i32
    return %c0_i32, %c0_i32_0 : i32, i32
  }
  func.func @transform_5(%arg0: i32, %arg1: i32) -> (i32, i32) {
    %c0_i32 = arith.constant 0 : i32
    %c0_i32_0 = arith.constant 0 : i32
    return %arg0, %c0_i32 : i32, i32
  }
}

</mosaic_0001>

<bundles_post_ra>
// kernel: lstm_model_forward.1
= control target key start
LH: loop header
LB: loop body
LE: loop exit
PB: predicated region body
PF: predicated region fallthrough
CT: control target
= control target key end

     0   :  { %s1160_s18 = smov 0   ;;  %s1162_s19 = smov 0   ;;  %s1335_s0 = inlined_call_operand.vmem [shape: s32[8,8,1], index: 0, kind: input, shape index: {}]   ;;  %s1336_s1 = inlined_call_operand.vmem [shape: f32[128,128], index: 1, kind: input, shape index: {}]   ;;  %s1337_s2 = inlined_call_operand.vmem [shape: bf16[32,128], index: 2, kind: input, shape index: {}]   ;;  %s1338_s3 = inlined_call_operand.vmem [shape: f32[32,128], index: 3, kind: input, shape index: {}]   ;;  %s1339_s4 = inlined_call_operand.vmem [shape: f32[1,128], index: 4, kind: input, shape index: {}]   ;;  %s1340_s5 = inlined_call_operand.vmem [shape: f32[8,128], index: 5, kind: output, shape index: {}]  }
   0x1   :  { %s1164_s20 = smov 0  }
   0x2 LB: > { %s24_s21 = sadd.s32 1, %s1114_s19  ;;  %p875_p0 = scmp.ge.s32.totalorder %s1118_s20, 1  ;;  %s1118_s20 = sphi %s1164_s20, %s15_s20   ;;  %s1114_s19 = sphi %s1162_s19, %s1342_s19   ;;  %s1110_s18 = sphi %s1160_s18, %s1341_s18  }
   0x3   : > { %p25_p1 = scmp.ge.s32.totalorder %s24_s21, 2  ;;  %p205_p2 = scmp.lt.s32.totalorder %s1118_s20, 3 }
   0x5   : > { %s1344_s21 = smov (%p25_p1, %s24_s21), 0  ;;  %p206_p3 = pnand %p875_p0, %p205_p2 }
   0x6   : > { %s876_s22 = sshll.u32 (!%p206_p3), %s1110_s18, 2  ;;  %p878_p5 = scmp.ne.s32.totalorder (!%p206_p3), %s1110_s18, 0 }
   0x7   : > { %209 = sbr.rel (%p206_p3) target bundleno = 3152 (0xc50), region = 40  ;;  %p236_p4 = scmp.lt.s32.totalorder (!%p206_p3), %s876_s22, 7 }
   0xc   : > { %s1346_s22 = smov (!%p236_p4, %s876_s22), 7  ;;  %252 = sbr.rel (%p878_p5) target bundleno = 19 (0x13), region = 44 }
   0xd   : > { %s877_s23 = sshll.u32 %s1346_s22, 3 }
   0xe   : > { %s1184_s26 = scalar_lea.vmem %s1335_s0, %s877_s23 }
  0x11   : > { %vm253_vm0 = vcmask 261120   ;;  %v1120_v0 = vmov 0.0  }
  0x12   : > { %254 = vst.msk [vmem:[#allocation2] sm:$0xff] %vm253_vm0, %v1120_v0  ;;  %255 = vst.msk [vmem:[#allocation3] sm:$0xff] %vm253_vm0, %v1120_v0 }
  0x13 PF: > { %v256_v1 = vld [vmem:[%s1184_s26] sm:$0xff]  ;;  %v301_v2 = vld [vmem:[%s1336_s1 + $0x78] sm:$0xff]  ;;  %v1121_v3 = vmov 0   ;;  %v300_v4 = vld [vmem:[%s1336_s1 + $0x70] sm:$0xff]  ;;  %v1122_v7 = vmov 0.0   ;;  %vm1123_vm1 = vmmov 0   ;;  %v260_v25 = vlaneseq }
  0x14   : > { %1056 = vset.pattern.permute.xlu0 %v1121_v3  ;;  %941 = vmatprep.subr.mxu0 %v301_v2  ;;  %v299_v5 = vld [vmem:[%s1336_s1 + $0x68] sm:$0xff]  ;;  %v298_v8 = vld [vmem:[%s1336_s1 + $0x60] sm:$0xff]  ;;  %v297_v10 = vld [vmem:[%s1336_s1 + $0x58] sm:$0xff]  ;;  %vm411_vm2 = vcmask 261120   ;;  %v1124_v28 = vmov 1.0   ;;  %s1125_s22 = smov 64  }
  0x15   : > { %263 = vperm.xlu0 %1056, %v256_v1   ;;  %942 = vmatpush3.msra.mxu0 %v301_v2  ;;  %v257_v6 = vld [vmem:[%s1184_s26 + $0x8] sm:$0xff]  ;;  %v1216_v11 = vld [vmem:[%s1337_s2] sm:$0xff]   ;;  %v296_v13 = vld [vmem:[%s1336_s1 + $0x50] sm:$0xff]  ;;  %v1261_v26 = vand.u32 127, %v260_v25  ;;  %s1126_s23 = smov 32   ;;  %p897_p6 = scmp.ne.s32.totalorder %s1110_s18, 1 }
  0x16   : > { %943 = vmatprep.subr.mxu0 %v300_v4  ;;  %979 = vmatprep.subr.bf16.mxu1 %v1122_v7  ;;  %v1207_v9 = vld [vmem:[%s1337_s2 + $0x8] sm:$0xff]   ;;  %v294_v16 = vld [vmem:[%s1336_s1 + $0x40] sm:$0xff]  ;;  %v293_v17 = vld [vmem:[%s1336_s1 + $0x38] sm:$0xff] }
  0x17   : > { %944 = vmatpush3.msra.mxu0 %v300_v4  ;;  %983 = vmatprep.mubr.msk.bf16.mxu1 %vm1123_vm1, %v1122_v7  ;;  %v295_v14 = vld [vmem:[%s1336_s1 + $0x48] sm:$0xff]  ;;  %v292_v18 = vld [vmem:[%s1336_s1 + $0x30] sm:$0xff]  ;;  %v290_v20 = vld [vmem:[%s1336_s1 + $0x20] sm:$0xff] }
  0x18   : > { %945 = vmatprep.subr.mxu0 %v299_v5  ;;  %1057 = vset.pattern.permute.xlu1 %v1121_v3  ;;  %v291_v19 = vld [vmem:[%s1336_s1 + $0x28] sm:$0xff]  ;;  %v289_v21 = vld [vmem:[%s1336_s1 + $0x18] sm:$0xff]  ;;  %v288_v22 = vld [vmem:[%s1336_s1 + $0x10] sm:$0xff] }
  0x19   : > { %266 = vperm.xlu0 %1056, %v257_v6   ;;  %946 = vmatpush3.msra.mxu0 %v299_v5  ;;  %v395_v12 = vld [vmem:[#allocation2] sm:$0xff]  ;;  %v287_v23 = vld [vmem:[%s1336_s1 + $0x8] sm:$0xff]  ;;  %v258_v2 = vld [vmem:[%s1184_s26 + $0x10] sm:$0xff] }
  0x1a   : > { %947 = vmatprep.subr.mxu0 %v298_v8  ;;  %980 = vmatpush3.bf16.msra.mxu1 %v1207_v9  ;;  %v398_v15 = vpack.c.bf16 %v395_v12, %v395_v12  ;;  %v286_v24 = vld [vmem:[%s1336_s1] sm:$0xff]  ;;  %v396_v38 = vld [vmem:[#allocation3] sm:$0xff] }
  0x1b   : > { %948 = vmatpush3.msra.mxu0 %v298_v8  ;;  %981 = vmatprep.subr.bf16.mxu1 %v1122_v7 }
  0x1c   : > { %949 = vmatprep.subr.mxu0 %v297_v10 }
  0x1d   : > { %950 = vmatpush3.msra.mxu0 %v297_v10  ;;  %v259_v10 = vld [vmem:[%s1184_s26 + $0x18] sm:$0xff]  ;;  %s1127_s26 = smov 96  }
  0x1e   : > { %951 = vmatprep.subr.mxu0 %v296_v13  ;;  %982 = vmatpush3.bf16.msra.mxu1 %v1216_v11 }
  0x1f   : > { %952 = vmatpush3.msra.mxu0 %v296_v13  ;;  %987 = vmatprep.subr.bf16.mxu1 %v1122_v7 }
  0x20   : > { %953 = vmatprep.subr.mxu0 %v295_v14 }
  0x21   : > { %954 = vmatpush3.msra.mxu0 %v295_v14  ;;  %984 = vmatmul.mubr.msk.bf16.vlgmr.msra.gmra.mxu1 %vm411_vm2, %v398_v15 }
  0x22   : > { %955 = vmatprep.subr.mxu0 %v294_v16  ;;  %988 = vmatpush3.bf16.msra.mxu1 %v1207_v9 }
  0x23   : > { %956 = vmatpush3.msra.mxu0 %v294_v16  ;;  %989 = vmatprep.subr.bf16.mxu1 %v1122_v7 }
  0x24   : > { %957 = vmatprep.subr.mxu0 %v293_v17  ;;  %991 = vmatprep.mubr.msk.bf16.mxu1 %vm1123_vm1, %v1122_v7 }
  0x25   : > { %958 = vmatpush3.msra.mxu0 %v293_v17 }
  0x26   : > { %959 = vmatprep.subr.mxu0 %v292_v18  ;;  %990 = vmatpush3.bf16.msra.mxu1 %v1216_v11 }
  0x27   : > { %960 = vmatpush3.msra.mxu0 %v292_v18  ;;  %995 = vmatprep.subr.bf16.mxu1 %v1122_v7 }
  0x28   : > { %961 = vmatprep.subr.mxu0 %v291_v19 }
  0x29   : > { %962 = vmatpush3.msra.mxu0 %v291_v19 }
  0x2a   : > { %963 = vmatprep.subr.mxu0 %v290_v20 }
  0x2b   : > { %964 = vmatpush3.msra.mxu0 %v290_v20 }
  0x2c   : > { %965 = vmatprep.subr.mxu0 %v289_v21 }
  0x2d   : > { %966 = vmatpush3.msra.mxu0 %v289_v21 }
  0x2e   : > { %967 = vmatprep.subr.mxu0 %v288_v22 }
  0x2f   : > { %968 = vmatpush3.msra.mxu0 %v288_v22 }
  0x30   : > { %969 = vmatprep.subr.mxu0 %v287_v23 }
  0x31   : > { %970 = vmatpush3.msra.mxu0 %v287_v23 }
  0x32   : > { %971 = vmatprep.subr.mxu0 %v286_v24 }
  0x33   : > { %972 = vmatpush3.msra.mxu0 %v286_v24 }
  0x90   : > { %v264_v27 = vpop.permute.xlu0 %263 }
  0x91   : > { %vm274_vm3 = vcmp.eq.s32.totalorder %v264_v27, %v1261_v26 }
  0x92   : > { %973 = vmatprep.mubr.msk.f32.mxu0 %vm274_vm3, %v1124_v28 }
  0x94   : > { %v267_v29 = vpop.permute.xlu0 %266 }
  0x95   : > { %vm275_vm4 = vcmp.eq.s32.totalorder %v267_v29, %v1261_v26 }
  0x96   : > { %974 = vmatmul.mubr.msk.f32.vlgmr.msra.gmra.mxu0 %vm275_vm4, %v1124_v28 }
  0xe1   : > { %v449_v30 = vpop.f32.mrf.mxu1 }
  0xe3   : > { %v985_v31 = vpop.f32.mrf.mxu1 }
  0xe5   : > { %v452_v32 = vpop.f32.mrf.mxu1 }
  0xe7   : > { %v986_v33 = vpop.f32.mrf.mxu1 }
 0x156   : > { %v975_v34 = vpop.f32.mrf.mxu0 }
 0x158   : > { %v368_v35 = vpop.f32.mrf.mxu0 }
 0x159   : > { %v455_v36 = vadd.f32 %v449_v30, %v368_v35 }
 0x15b   : > { %1060 = vtanh.f32 %v455_v36  ;;  %v890_v39 = vmul.f32 -1.442695, %v455_v36 }
 0x15d   : > { %1062 = vpow2.f32 %v890_v39 }
 0x168   : > { %v1061_v37 = vpop.eup %1060 }
 0x169   : > { %469 = vrot.lane.b32.xlu1 %v1061_v37, %s1125_s22 }
 0x16a   : > { %v1063_v40 = vpop.eup %1062 }
 0x16b   : > { %v459_v41 = vadd.f32 1.0, %v1063_v40 }
 0x16d   : > { %464 = vrot.lane.b32.xlu1 %v396_v38, %s1126_s23  ;;  %1064 = vrcp.f32 %v459_v41 }
 0x17a   : > { %v1065_v42 = vpop.eup %1064 }
 0x1db   : > { %v470_v43 = vpop.permute.xlu1 %469 }
 0x1dc   : > { %v472_v44 = vmul.f32 %v1065_v42, %v470_v43 }
 0x1de   : > { %474 = vrot.lane.b32.xlu0 %v472_v44, %s1126_s23 }
 0x1df   : > { %v465_v45 = vpop.permute.xlu1 %464 }
 0x1e0   : > { %v467_v46 = vmul.f32 %v1065_v42, %v465_v45 }
 0x250   : > { %v475_v47 = vpop.permute.xlu0 %474 }
 0x251   : > { %v477_v48 = vadd.f32 %v475_v47, %v467_v46 }
 0x253   : > { %1066 = vtanh.f32 %v477_v48 }
 0x260   : > { %v1067_v49 = vpop.eup %1066 }
 0x261   : > { %480 = vrot.lane.b32.xlu1 %v1067_v49, %s1125_s22 }
 0x2d3   : > { %v481_v50 = vpop.permute.xlu1 %480 }
 0x2d4   : > { %v483_v51 = vmul.f32 %v1065_v42, %v481_v50 }
 0x2d6   : > { %v486_v52 = vpack.c.bf16 %v483_v51, %v483_v51 }
 0x2d8   : > { %488 = vrot.lane.b32.xlu0 %v486_v52, %s1126_s23 }
 0x34a   : > { %v489_v53 = vpop.permute.xlu0 %488 }
 0x34b   : > { %992 = vmatmul.mubr.msk.bf16.vlgmr.msra.gmra.mxu1 %vm411_vm2, %v489_v53 }
 0x34c   : > { %996 = vmatpush3.bf16.msra.mxu1 %v1207_v9  ;;  %999 = vmatprep.mubr.msk.bf16.mxu1 %vm1123_vm1, %v1122_v7 }
 0x34d   : > { %997 = vmatprep.subr.bf16.mxu1 %v1122_v7 }
 0x350   : > { %998 = vmatpush3.bf16.msra.mxu1 %v1216_v11 }
 0x351   : > { %1003 = vmatprep.subr.bf16.mxu1 %v1122_v7 }
 0x40b   : > { %v527_v54 = vpop.f32.mrf.mxu1 }
 0x40c   : > { %v533_v55 = vadd.f32 %v975_v34, %v527_v54 }
 0x40d   : > { %v993_v56 = vpop.f32.mrf.mxu1 }
 0x40e   : > { %1068 = vtanh.f32 %v533_v55  ;;  %v892_v60 = vmul.f32 -1.442695, %v533_v55 }
 0x40f   : > { %v530_v57 = vpop.f32.mrf.mxu1 }
 0x410   : > { %1070 = vpow2.f32 %v892_v60 }
 0x411   : > { %v994_v58 = vpop.f32.mrf.mxu1 }
 0x41b   : > { %v1069_v59 = vpop.eup %1068 }
 0x41c   : > { %543 = vrot.lane.b32.xlu1 %v1069_v59, %s1125_s22 }
 0x41d   : > { %v1071_v61 = vpop.eup %1070 }
 0x41e   : > { %v537_v62 = vadd.f32 1.0, %v1071_v61 }
 0x420   : > { %1072 = vrcp.f32 %v537_v62 }
 0x42d   : > { %v1073_v63 = vpop.eup %1072 }
 0x42e   : > { %v541_v3 = vmul.f32 %v1073_v63, %v477_v48 }
 0x48e   : > { %v544_v0 = vpop.permute.xlu1 %543 }
 0x48f   : > { %v546_v1 = vmul.f32 %v1073_v63, %v544_v0 }
 0x491   : > { %548 = vrot.lane.b32.xlu0 %v546_v1, %s1126_s23 }
 0x495   : > { %269 = vperm.xlu0 %1056, %v258_v2  }
 0x503   : > { %v549_v4 = vpop.permute.xlu0 %548 }
 0x504   : > { %v551_v5 = vadd.f32 %v549_v4, %v541_v3 }
 0x506   : > { %1074 = vtanh.f32 %v551_v5 }
 0x510   : > { %v270_v6 = vpop.permute.xlu0 %269 }
 0x511   : > { %vm276_vm5 = vcmp.eq.s32.totalorder %v270_v6, %v1261_v26 }
 0x512   : > { %976 = vmatprep.mubr.msk.f32.mxu0 %vm276_vm5, %v1124_v28 }
 0x513   : > { %v1075_v8 = vpop.eup %1074 }
 0x514   : > { %554 = vrot.lane.b32.xlu1 %v1075_v8, %s1125_s22 }
 0x518   : > { %272 = vperm.xlu1 %1057, %v259_v10  }
 0x586   : > { %v555_v12 = vpop.permute.xlu1 %554 }
 0x587   : > { %v557_v13 = vmul.f32 %v1073_v63, %v555_v12 }
 0x589   : > { %v560_v14 = vpack.c.bf16 %v557_v13, %v557_v13 }
 0x58b   : > { %562 = vrot.lane.b32.xlu0 %v560_v14, %s1126_s23 }
 0x593   : > { %v273_v15 = vpop.permute.xlu1 %272 }
 0x594   : > { %vm277_vm6 = vcmp.eq.s32.totalorder %v273_v15, %v1261_v26 }
 0x595   : > { %977 = vmatmul.mubr.msk.f32.gmra.mxu0 %vm277_vm6, %v1124_v28 }
 0x5fd   : > { %v563_v16 = vpop.permute.xlu0 %562 }
 0x5fe   : > { %1000 = vmatmul.mubr.msk.bf16.vlgmr.msra.gmra.mxu1 %vm411_vm2, %v563_v16 }
 0x5ff   : > { %1004 = vmatpush3.bf16.msra.mxu1 %v1207_v9  ;;  %1007 = vmatprep.mubr.msk.bf16.mxu1 %vm1123_vm1, %v1122_v7 }
 0x600   : > { %1005 = vmatprep.subr.bf16.mxu1 %v1122_v7 }
 0x603   : > { %1006 = vmatpush3.bf16.msra.mxu1 %v1216_v11 }
 0x655   : > { %v978_v17 = vpop.f32.mrf.mxu0 }
 0x657   : > { %v378_v18 = vpop.f32.mrf.mxu0 }
 0x6be   : > { %v601_v19 = vpop.f32.mrf.mxu1 }
 0x6bf   : > { %v607_v20 = vadd.f32 %v601_v19, %v378_v18 }
 0x6c0   : > { %v1001_v21 = vpop.f32.mrf.mxu1 }
 0x6c1   : > { %1076 = vtanh.f32 %v607_v20  ;;  %v894_v25 = vmul.f32 -1.442695, %v607_v20 }
 0x6c2   : > { %v604_v22 = vpop.f32.mrf.mxu1 }
 0x6c3   : > { %1078 = vpow2.f32 %v894_v25 }
 0x6c4   : > { %v1002_v23 = vpop.f32.mrf.mxu1 }
 0x6ce   : > { %v1077_v24 = vpop.eup %1076 }
 0x6cf   : > { %617 = vrot.lane.b32.xlu1 %v1077_v24, %s1125_s22 }
 0x6d0   : > { %v1079_v9 = vpop.eup %1078 }
 0x6d1   : > { %v611_v26 = vadd.f32 1.0, %v1079_v9 }
 0x6d3   : > { %1080 = vrcp.f32 %v611_v26 }
 0x6e0   : > { %v1081_v27 = vpop.eup %1080 }
 0x6e1   : > { %v615_v11 = vmul.f32 %v1081_v27, %v551_v5 }
 0x741   : > { %v618_v7 = vpop.permute.xlu1 %617 }
 0x742   : > { %v620_v28 = vmul.f32 %v1081_v27, %v618_v7 }
 0x744   : > { %622 = vrot.lane.b32.xlu0 %v620_v28, %s1126_s23 }
 0x7b6   : > { %v623_v29 = vpop.permute.xlu0 %622 }
 0x7b7   : > { %v625_v30 = vadd.f32 %v623_v29, %v615_v11 }
 0x7b9   : > { %1082 = vtanh.f32 %v625_v30 }
 0x7c6   : > { %v1083_v31 = vpop.eup %1082 }
 0x7c7   : > { %628 = vrot.lane.b32.xlu1 %v1083_v31, %s1125_s22 }
 0x839   : > { %v629_v32 = vpop.permute.xlu1 %628 }
 0x83a   : > { %v631_v33 = vmul.f32 %v1081_v27, %v629_v32 }
 0x83c   : > { %v634_v34 = vpack.c.bf16 %v631_v33, %v631_v33 }
 0x83e   : > { %636 = vrot.lane.b32.xlu0 %v634_v34, %s1126_s23 }
 0x8b0   : > { %v637_v35 = vpop.permute.xlu0 %636 }
 0x8b1   : > { %1008 = vmatmul.mubr.msk.bf16.vlgmr.msra.gmra.mxu1 %vm411_vm2, %v637_v35 }
 0x971   : > { %v675_v36 = vpop.f32.mrf.mxu1 }
 0x972   : > { %v681_v37 = vadd.f32 %v978_v17, %v675_v36 }
 0x973   : > { %v1009_v38 = vpop.f32.mrf.mxu1 }
 0x974   : > { %1084 = vtanh.f32 %v681_v37  ;;  %v896_v42 = vmul.f32 -1.442695, %v681_v37 }
 0x975   : > { %v678_v39 = vpop.f32.mrf.mxu1 }
 0x976   : > { %1086 = vpow2.f32 %v896_v42 }
 0x977   : > { %v1010_v40 = vpop.f32.mrf.mxu1 }
 0x981   : > { %v1085_v41 = vpop.eup %1084 }
 0x982   : > { %691 = vrot.lane.b32.xlu1 %v1085_v41, %s1125_s22 }
 0x983   : > { %v1087_v43 = vpop.eup %1086 }
 0x984   : > { %v685_v44 = vadd.f32 1.0, %v1087_v43 }
 0x986   : > { %1088 = vrcp.f32 %v685_v44 }
 0x993   : > { %v1089_v45 = vpop.eup %1088 }
 0x994   : > { %v689_v48 = vmul.f32 %v1089_v45, %v625_v30 }
 0x9f4   : > { %v692_v46 = vpop.permute.xlu1 %691 }
 0x9f5   : > { %v694_v47 = vmul.f32 %v1089_v45, %v692_v46 }
 0x9f7   : > { %696 = vrot.lane.b32.xlu0 %v694_v47, %s1126_s23 }
 0xa69   : > { %v697_v49 = vpop.permute.xlu0 %696 }
 0xa6a   : > { %v699_v50 = vadd.f32 %v697_v49, %v689_v48 }
 0xa6c   : > { %1090 = vtanh.f32 %v699_v50 }
 0xa79   : > { %v1091_v51 = vpop.eup %1090 }
 0xa7a   : > { %702 = vrot.lane.b32.xlu1 %v1091_v51, %s1125_s22 }
 0xa7e   : > { %712 = vrot.lane.b32.xlu1 %v699_v50, %s1127_s26 }
 0xaec   : > { %v703_v52 = vpop.permute.xlu1 %702 }
 0xaed   : > { %v705_v53 = vmul.f32 %v1089_v45, %v703_v52 }
 0xaef   : > { %707 = vrot.lane.b32.xlu0 %v705_v53, %s1126_s23 }
 0xaf0   : > { %v713_v54 = vpop.permute.xlu1 %712 }
 0xaf1   : > { %715 = vst.msk [vmem:[#allocation3] sm:$0xff] %vm411_vm2, %v713_v54 }
 0xb5e   : > { %719 = sbr.rel (%p897_p6) target bundleno = 3152 (0xc50), region = 48 }
 0xb61   : > { %v708_v55 = vpop.permute.xlu0 %707 }
 0xb62   : > { %710 = vst.msk [vmem:[#allocation2] sm:$0xff] %vm411_vm2, %v708_v55 }
 0xb63   : > { %v723_v56 = vld [vmem:[%s1338_s3 + $0x18] sm:$0xff]  ;;  %v1128_v57 = vmov 0.0   ;;  %v722_v58 = vld [vmem:[%s1338_s3 + $0x10] sm:$0xff]  ;;  %vm1129_vm7 = vmmov 0   ;;  %v721_v59 = vld [vmem:[%s1338_s3 + $0x8] sm:$0xff] }
 0xb64   : > { %1011 = vmatprep.subr.mxu0 %v1128_v57  ;;  %1019 = vmatprep.mubr.msk.f32.mxu0 %vm1129_vm7, %v1128_v57  ;;  %v720_v60 = vld [vmem:[%s1338_s3] sm:$0xff] }
 0xb65   : > { %1012 = vmatpush3.msra.mxu0 %v723_v56  ;;  %v898_v61 = vld [vmem:[%s1339_s4] ss:$0 sm:$0xff] }
 0xb66   : > { %1013 = vmatprep.subr.mxu0 %v1128_v57 }
 0xb67   : > { %1014 = vmatpush3.msra.mxu0 %v722_v58 }
 0xb68   : > { %1015 = vmatprep.subr.mxu0 %v1128_v57 }
 0xb69   : > { %1016 = vmatpush3.msra.mxu0 %v721_v59 }
 0xb6a   : > { %1017 = vmatprep.subr.mxu0 %v1128_v57 }
 0xb6b   : > { %1018 = vmatpush3.msra.mxu0 %v720_v60 }
 0xb6c   : > { %1020 = vmatmul.mubr.msk.f32.vlgmr.msra.gmra.mxu0 %vm411_vm2, %v708_v55 }
 0xc2c   : > { %v799_v62 = vpop.f32.mrf.mxu0 }
 0xc2d   : > { %v800_v63 = vadd.f32 %v898_v61, %v799_v62 }
 0xc2e   : > { %v1021_v0 = vpop.f32.mrf.mxu0 }
 0xc2f   : > { %v900_v1 = vmul.f32 -1.442695, %v800_v63 }
 0xc31   : > { %1092 = vpow2.f32 %v900_v1 }
 0xc3e   : > { %v1093_v2 = vpop.eup %1092 }
 0xc3f   : > { %v806_v3 = vadd.f32 1.0, %v1093_v2 }
 0xc41   : > { %1094 = vrcp.f32 %v806_v3 }
 0xc4e   : > { %v1095_v4 = vpop.eup %1094 }
 0xc4f   : > { %809 = vst [vmem:[%s1340_s5] sm:$0xff] %v1095_v4 }
 0xc50 PF: > { %s15_s20 = sadd.s32 1, %s1118_s20   ;;  %s1341_s18 = smov %s1114_s19 }
 0xc51   : > { %p12_p7 = scmp.ge.s32.totalorder %s15_s20, 4   ;;  %s1342_s19 = smov %s1344_s21 }
 0xc53   :  { %14 = sbr.rel (!%p12_p7) target bundleno = 2 (0x2), region = 81 }

</bundles_post_ra>
